<compile_context>
chip_gen: v6e
topology: v6e:2x2x1
jax: 0.10.0
libtpu: 0.0.40
codegen_flags: <defaults>
</compile_context>

<pallas_src>
import functools

import jax
import jax.numpy as jnp
from jax.experimental import pallas as pl
from jax.experimental.pallas import tpu as pltpu


def _dropout_kernel(seed_ref, x_ref, o_ref, *, threshold, multiplier, lanes,
                    block_rows):
    # Global element index of every lane in this block.
    i = pl.program_id(0)
    shape = x_ref.shape  # (block_rows, lanes)
    r = jax.lax.broadcasted_iota(jnp.int32, shape, 0).astype(jnp.uint32)
    c = jax.lax.broadcasted_iota(jnp.int32, shape, 1).astype(jnp.uint32)
    row0 = (i * block_rows).astype(jnp.uint32)
    idx = (r + row0) * jnp.uint32(lanes) + c

    # Counter-based PRNG: splitmix/murmur3 finalizer over (index, seed).
    seed = seed_ref[0].astype(jnp.uint32)
    h = idx ^ (seed * jnp.uint32(0x9E3779B9))
    h = (h ^ (h >> jnp.uint32(16))) * jnp.uint32(0x85EBCA6B)
    h = (h ^ (h >> jnp.uint32(13))) * jnp.uint32(0xC2B2AE35)
    h = h ^ (h >> jnp.uint32(16))

    # keep iff uniform > p  <=>  raw bits > round(p * 2^32)  (single compare)
    keep = h > jnp.uint32(threshold)
    o_ref[...] = jnp.where(keep,
                           x_ref[...] * jnp.float32(multiplier),
                           jnp.float32(0.0))


def my_dropout(x, *, p=0.5, seed=0, training=True):
    """Forward pass of MyDropout. x: float array (any shape, e.g. NCHW)."""
    if not training:
        return x

    multiplier = 1.0 / (1.0 - p) if p < 1 else 1.0
    threshold = int(round(p * (1 << 32)))
    threshold = max(0, min(threshold, (1 << 32) - 1))

    orig_shape = x.shape
    orig_dtype = x.dtype
    xf = x.astype(jnp.float32).reshape(-1)
    n = xf.size

    # Lane-dense 2-D slab: wide last dim (1024) for unmasked stores.
    lanes = 1024
    block_rows_max = 512  # 512 x 1024 x 4B = 2 MiB per block (v5e/v7x safe)
    rows = -(-n // lanes)
    if rows <= block_rows_max:
        block_rows = rows
        grid_rows = 1
    else:
        block_rows = block_rows_max
        grid_rows = -(-rows // block_rows)
    rows_padded = grid_rows * block_rows
    n_padded = rows_padded * lanes
    if n_padded != n:
        xf = jnp.pad(xf, (0, n_padded - n))
    x2d = xf.reshape(rows_padded, lanes)

    seed_arr = jnp.array([seed], dtype=jnp.int32)

    kernel = functools.partial(
        _dropout_kernel,
        threshold=threshold,
        multiplier=multiplier,
        lanes=lanes,
        block_rows=block_rows,
    )

    compiler_params = None
    if jax.default_backend() == "tpu":
        compiler_params = pltpu.CompilerParams(
            dimension_semantics=("parallel",))

    out2d = pl.pallas_call(
        kernel,
        out_shape=jax.ShapeDtypeStruct((rows_padded, lanes), jnp.float32),
        grid=(grid_rows,),
        in_specs=[
            pl.BlockSpec(memory_space=pltpu.MemorySpace.SMEM),      # seed
            pl.BlockSpec((block_rows, lanes), lambda i: (i, 0)),    # x tile
        ],
        out_specs=pl.BlockSpec((block_rows, lanes), lambda i: (i, 0)),
        compiler_params=compiler_params,
    )(seed_arr, x2d)

    return out2d.reshape(-1)[:n].reshape(orig_shape).astype(orig_dtype)


if __name__ == "__main__":
    key = jax.random.PRNGKey(0)
    x = jax.random.normal(key, (2, 4, 16, 16), dtype=jnp.float32)  # NCHW

    p = 0.5
    y = my_dropout(x, p=p, seed=1234, training=True)
    y = jax.block_until_ready(y)

    # sanity checks: zeros where dropped, scaled 1/(1-p) where kept
    assert y.shape == x.shape and y.dtype == x.dtype
    mask = y != 0.0
    kept_ok = jnp.allclose(jnp.where(mask, y, 0.0),
                           jnp.where(mask, x * (1.0 / (1.0 - p)), 0.0),
                           atol=1e-5)
    assert bool(kept_ok)
    # keep fraction should be roughly 1 - p
    frac = float(jnp.mean(mask.astype(jnp.float32)))
    assert 0.3 < frac < 0.7, frac
    # eval mode passes input through unchanged
    y_eval = my_dropout(x, p=p, training=False)
    assert bool(jnp.array_equal(y_eval, x))

    print("KERNEL_OK")
</pallas_src>

<mosaic_0001>
module attributes {stable_mosaic.version = 11 : i64} {
  func.func @_dropout_kernel(%arg0: i32, %arg1: memref<1xi32, #tpu.memory_space<smem>>, %arg2: memref<2x1024xf32, #tpu.memory_space<vmem>>, %arg3: memref<2x1024xf32, #tpu.memory_space<vmem>>) attributes {dimension_semantics = [#tpu.dimension_semantics<arbitrary>], iteration_bounds = array<i64: 1>, scalar_prefetch = 0 : i64, scratch_operands = 0 : i64, tpu.core_type = #tpu.core_type<tc>, window_params = [{transform_indices = @transform_0, window_bounds = array<i64: 1>}, {transform_indices = @transform_1, window_bounds = array<i64: 2, 1024>}, {transform_indices = @transform_2, window_bounds = array<i64: 2, 1024>}]} {
    %0 = tpu.iota {dimensions = array<i32: 0>} : vector<2x1024xi32>
    %1 = tpu.iota {dimensions = array<i32: 1>} : vector<2x1024xi32>
    %c2_i32 = arith.constant 2 : i32
    %2 = arith.muli %arg0, %c2_i32 : i32
    %3 = vector.broadcast %2 : i32 to vector<2x1024xi32>
    %4 = arith.addi %0, %3 : vector<2x1024xi32>
    %c1024_i32 = arith.constant 1024 : i32
    %5 = vector.broadcast %c1024_i32 : i32 to vector<2x1024xi32>
    %6 = arith.muli %4, %5 : vector<2x1024xi32>
    %7 = arith.addi %6, %1 : vector<2x1024xi32>
    %c0 = arith.constant 0 : index
    %8 = memref.load %arg1[%c0] : memref<1xi32, #tpu.memory_space<smem>>
    %c-1640531527_i32 = arith.constant -1640531527 : i32
    %9 = arith.muli %8, %c-1640531527_i32 : i32
    %10 = vector.broadcast %9 : i32 to vector<2x1024xi32>
    %11 = arith.xori %7, %10 : vector<2x1024xi32>
    %c16_i32 = arith.constant 16 : i32
    %12 = vector.broadcast %c16_i32 : i32 to vector<2x1024xi32>
    %13 = arith.shrui %11, %12 : vector<2x1024xi32>
    %14 = arith.xori %11, %13 : vector<2x1024xi32>
    %c-2048144789_i32 = arith.constant -2048144789 : i32
    %15 = vector.broadcast %c-2048144789_i32 : i32 to vector<2x1024xi32>
    %16 = arith.muli %14, %15 : vector<2x1024xi32>
    %c13_i32 = arith.constant 13 : i32
    %17 = vector.broadcast %c13_i32 : i32 to vector<2x1024xi32>
    %18 = arith.shrui %16, %17 : vector<2x1024xi32>
    %19 = arith.xori %16, %18 : vector<2x1024xi32>
    %c-1028477387_i32 = arith.constant -1028477387 : i32
    %20 = vector.broadcast %c-1028477387_i32 : i32 to vector<2x1024xi32>
    %21 = arith.muli %19, %20 : vector<2x1024xi32>
    %c16_i32_0 = arith.constant 16 : i32
    %22 = vector.broadcast %c16_i32_0 : i32 to vector<2x1024xi32>
    %23 = arith.shrui %21, %22 : vector<2x1024xi32>
    %24 = arith.xori %21, %23 : vector<2x1024xi32>
    %c-2147483648_i32 = arith.constant -2147483648 : i32
    %25 = vector.broadcast %c-2147483648_i32 : i32 to vector<2x1024xi32>
    %26 = arith.cmpi ugt, %24, %25 : vector<2x1024xi32>
    %c0_1 = arith.constant 0 : index
    %c0_2 = arith.constant 0 : index
    %27 = vector.load %arg2[%c0_1, %c0_2] : memref<2x1024xf32, #tpu.memory_space<vmem>>, vector<2x1024xf32>
    %cst = arith.constant 2.000000e+00 : f32
    %28 = vector.broadcast %cst : f32 to vector<2x1024xf32>
    %29 = arith.mulf %27, %28 : vector<2x1024xf32>
    %cst_3 = arith.constant 0.000000e+00 : f32
    %30 = vector.broadcast %cst_3 : f32 to vector<2x1024xf32>
    %31 = arith.select %26, %29, %30 : vector<2x1024xi1>, vector<2x1024xf32>
    %c0_4 = arith.constant 0 : index
    %c0_5 = arith.constant 0 : index
    %32 = vector.load %arg3[%c0_4, %c0_5] : memref<2x1024xf32, #tpu.memory_space<vmem>>, vector<2x1024xf32>
    tpu.vector_store %arg3[%c0_4, %c0_5], %31 {strides = array<i32>} : memref<2x1024xf32, #tpu.memory_space<vmem>>, vector<2x1024xf32>,
    return
  }
  func.func @transform_0(%arg0: i32) -> i32 {
    %c0_i32 = arith.constant 0 : i32
    %c0_i32_0 = arith.constant 0 : i32
    return %c0_i32 : i32
  }
  func.func @transform_1(%arg0: i32) -> (i32, i32) {
    %c0_i32 = arith.constant 0 : i32
    %c0_i32_0 = arith.constant 0 : i32
    return %arg0, %c0_i32 : i32, i32
  }
  func.func @transform_2(%arg0: i32) -> (i32, i32) {
    %c0_i32 = arith.constant 0 : i32
    %c0_i32_0 = arith.constant 0 : i32
    return %arg0, %c0_i32 : i32, i32
  }
}

</mosaic_0001>

<bundles_post_ra>
// kernel: tpu_custom_call.1
= control target key start
LH: loop header
LB: loop body
LE: loop exit
PB: predicated region body
PF: predicated region fallthrough
CT: control target
= control target key end

     0   :  { %8 = vsyncpa [#allocation4], 0  ;;  %s342_s0 = inlined_call_operand.<no memory space> [shape: s32[1], index: 0, kind: input, shape index: {}]   ;;  %s343_s1 = inlined_call_operand.hbm [shape: f32[2,1024], index: 1, kind: input, shape index: {}]   ;;  %s344_s2 = inlined_call_operand.hbm [shape: f32[2,1024], index: 2, kind: output, shape index: {}]  }
   0x1   :  { %9 = vsyncpa [#allocation5], 0  ;;  %s295_s9 = smov [#allocation3]  }
   0x2   :  { %s18_s10 = sshll.u32 %s295_s9, 4  ;;  %s19_s10 = int_to_ptr.vmem [resolvable:$true] %s18_s10 }
   0x3   :  { %s259_s11 = scalar_lea.vmem %s19_s10, 256  ;;  %p264_p1 = scmp.lt.s32.totalorder %s19_s10, %s19_s10 }
   0x4   :  { %p260_p0 = scmp.ne.s32.totalorder %s19_s10, %s259_s11  ;;  %p265_p2 = scmp.lt.s32.totalorder %s259_s11, %s259_s11 }
   0x6   :  { %p266_p3 = por %p265_p2, %p264_p1 }
   0x8   :  { %p267_p4 = pnand %p266_p3, %p260_p0 }
   0xa   :  { %270 = shalt.err (!%p267_p4)
}
   0xb   :  { %21 = dma.hbm_to_vmem [thread:$0]  %s343_s1, 256, %s19_s10, [#allocation4]  }
   0xc   :  { %291 = dma.done.wait [#allocation4], 256  }
   0xd   :  { %292 = vsyncadd [#allocation4], 4294967040  ;;  %v25_v0 = vlaneseq  ;;  %s49_s16 = smul.u32 2654435769, %s342_s0  ;;  %v296_v1 = vmov 1983009808  }
   0xe   :  { %v139_v2 = vunpack.c.l.s4 %v296_v1  ;;  %v131_v19 = vld [vmem:[#allocation3] sm:$0xff]  ;;  %s297_s0 = smov [#allocation6]  }
   0xf   :  { %v26_v3 = vshrl.u32 %v25_v0, 7  ;;  %v28_v4 = vand.u32 127, %v25_v0  ;;  %v50_v5 = vstv %s49_s16  ;;  %v133_v28 = vmul.f32 2.0, %v131_v19  ;;  %s239_s1 = sshll.u32 %s297_s0, 4  ;;  %s240_s1 = int_to_ptr.vmem [resolvable:$true] %s239_s1 }
  0x10   :  { %v140_v6 = vunpack.c.0.s8 %v139_v2  ;;  %s271_s17 = scalar_lea.vmem %s240_s1, 256  ;;  %p276_p6 = scmp.lt.s32.totalorder %s240_s1, %s240_s1 }
  0x11   :  { %v29_v7 = vadd.s32 128, %v28_v4  ;;  %v30_v8 = vadd.s32 256, %v28_v4  ;;  %v31_v9 = vadd.s32 384, %v28_v4  ;;  %v39_v10 = vmul.u32 1024, %v26_v3  ;;  %p272_p5 = scmp.ne.s32.totalorder %s240_s1, %s271_s17  ;;  %p277_p7 = scmp.lt.s32.totalorder %s271_s17, %s271_s17 }
  0x12   :  { %v319_v11 = vsub.s32 %v140_v6, %v26_v3  ;;  %v32_v12 = vadd.s32 512, %v28_v4  ;;  %v33_v13 = vadd.s32 640, %v28_v4  ;;  %v34_v14 = vadd.s32 768, %v28_v4 }
  0x13   :  { %v40_v15 = vadd.s32 %v39_v10, %v28_v4  ;;  %v41_v16 = vadd.s32 %v39_v10, %v29_v7  ;;  %v42_v17 = vadd.s32 %v39_v10, %v30_v8  ;;  %v43_v18 = vadd.s32 %v39_v10, %v31_v9  ;;  %p278_p8 = por %p277_p7, %p276_p6 }
  0x14   :  { %v35_v20 = vadd.s32 896, %v28_v4  ;;  %v44_v21 = vadd.s32 %v39_v10, %v32_v12  ;;  %v45_v22 = vadd.s32 %v39_v10, %v33_v13  ;;  %v46_v23 = vadd.s32 %v39_v10, %v34_v14 }
  0x15   :  { %v51_v24 = vxor.u32 %v50_v5, %v40_v15  ;;  %v52_v25 = vxor.u32 %v50_v5, %v41_v16  ;;  %v53_v26 = vxor.u32 %v50_v5, %v42_v17  ;;  %v54_v27 = vxor.u32 %v50_v5, %v43_v18  ;;  %p279_p9 = pnand %p278_p8, %p272_p5 }
  0x16   :  { %v47_v29 = vadd.s32 %v39_v10, %v35_v20  ;;  %v55_v30 = vxor.u32 %v50_v5, %v44_v21  ;;  %v56_v31 = vxor.u32 %v50_v5, %v45_v22  ;;  %v137_v36 = vcombine.high %v133_v28, %v133_v28 }
  0x17   :  { %v59_v32 = vshrl.u32 %v51_v24, 16  ;;  %v60_v33 = vshrl.u32 %v52_v25, 16  ;;  %v61_v34 = vshrl.u32 %v53_v26, 16  ;;  %v62_v35 = vshrl.u32 %v54_v27, 16 }
  0x18   :  { %v322_v37 = vrot.slane %v133_v28, %v319_v11  ;;  %v57_v38 = vxor.u32 %v50_v5, %v46_v23  ;;  %v58_v39 = vxor.u32 %v50_v5, %v47_v29  ;;  %v325_v44 = vrot.slane %v137_v36, %v319_v11 }
  0x19   :  { %v67_v40 = vxor.u32 %v59_v32, %v51_v24  ;;  %v68_v41 = vxor.u32 %v60_v33, %v52_v25  ;;  %v69_v42 = vxor.u32 %v61_v34, %v53_v26  ;;  %v70_v43 = vxor.u32 %v62_v35, %v54_v27 }
  0x1a   :  { %v152_v45 = vcombine.high %v322_v37, %v322_v37  ;;  %v63_v46 = vshrl.u32 %v55_v30, 16  ;;  %v64_v47 = vshrl.u32 %v56_v31, 16  ;;  %v65_v50 = vshrl.u32 %v57_v38, 16 }
  0x1b   :  { %v75_v48 = vmul.u32 2246822507, %v67_v40  ;;  %v76_v49 = vmul.u32 2246822507, %v68_v41  ;;  %v66_v51 = vshrl.u32 %v58_v39, 16  ;;  %v153_v54 = vcombine.high %v325_v44, %v325_v44 }
  0x1c   :  { %v77_v52 = vmul.u32 2246822507, %v69_v42  ;;  %v78_v53 = vmul.u32 2246822507, %v70_v43  ;;  %v71_v55 = vxor.u32 %v63_v46, %v55_v30  ;;  %v72_v58 = vxor.u32 %v64_v47, %v56_v31 }
  0x1d   :  { %v83_v56 = vshrl.u32 %v75_v48, 13  ;;  %v84_v57 = vshrl.u32 %v76_v49, 13  ;;  %v73_v59 = vxor.u32 %v65_v50, %v57_v38  ;;  %v74_v62 = vxor.u32 %v66_v51, %v58_v39  ;;  %v132_v38 = vld [vmem:[#allocation3 + $0x8] sm:$0xff] }
  0x1e   :  { %v85_v60 = vshrl.u32 %v77_v52, 13  ;;  %v86_v61 = vshrl.u32 %v78_v53, 13  ;;  %v79_v63 = vmul.u32 2246822507, %v71_v55  ;;  %v80_v2 = vmul.u32 2246822507, %v72_v58 }
  0x1f   :  { %v91_v0 = vxor.u32 %v83_v56, %v75_v48  ;;  %v92_v1 = vxor.u32 %v84_v57, %v76_v49  ;;  %v81_v3 = vmul.u32 2246822507, %v73_v59  ;;  %v82_v6 = vmul.u32 2246822507, %v74_v62 }
  0x20   :  { %v93_v4 = vxor.u32 %v85_v60, %v77_v52  ;;  %v94_v5 = vxor.u32 %v86_v61, %v78_v53  ;;  %v87_v7 = vshrl.u32 %v79_v63, 13  ;;  %v88_v10 = vshrl.u32 %v80_v2, 13 }
  0x21   :  { %v99_v8 = vmul.u32 3266489909, %v91_v0  ;;  %v100_v9 = vmul.u32 3266489909, %v92_v1  ;;  %v89_v12 = vshrl.u32 %v81_v3, 13  ;;  %v90_v15 = vshrl.u32 %v82_v6, 13 }
  0x22   :  { %v101_v13 = vmul.u32 3266489909, %v93_v4  ;;  %v102_v14 = vmul.u32 3266489909, %v94_v5  ;;  %v95_v16 = vxor.u32 %v87_v7, %v79_v63  ;;  %v96_v19 = vxor.u32 %v88_v10, %v80_v2 }
  0x23   :  { %v107_v17 = vshrl.u32 %v99_v8, 16  ;;  %v108_v18 = vshrl.u32 %v100_v9, 16  ;;  %v97_v20 = vxor.u32 %v89_v12, %v81_v3  ;;  %v98_v23 = vxor.u32 %v90_v15, %v82_v6 }
  0x24   :  { %v109_v21 = vshrl.u32 %v101_v13, 16  ;;  %v110_v22 = vshrl.u32 %v102_v14, 16  ;;  %v103_v24 = vmul.u32 3266489909, %v95_v16  ;;  %v104_v27 = vmul.u32 3266489909, %v96_v19 }
  0x25   :  { %v115_v25 = vxor.u32 %v107_v17, %v99_v8  ;;  %v116_v26 = vxor.u32 %v108_v18, %v100_v9  ;;  %v105_v28 = vmul.u32 3266489909, %v97_v20  ;;  %v106_v31 = vmul.u32 3266489909, %v98_v23 }
  0x26   :  { %v117_v29 = vxor.u32 %v109_v21, %v101_v13  ;;  %v118_v30 = vxor.u32 %v110_v22, %v102_v14  ;;  %v111_v32 = vshrl.u32 %v103_v24, 16  ;;  %v112_v33 = vshrl.u32 %v104_v27, 16 }
  0x27   :  { %vm123_vm0 = vcmp.gt.u32.totalorder %v115_v25, 2147483648  ;;  %vm124_vm1 = vcmp.gt.u32.totalorder %v116_v26, 2147483648  ;;  %v113_v34 = vshrl.u32 %v105_v28, 16  ;;  %v114_v42 = vshrl.u32 %v106_v31, 16 }
  0x28   :  { %vm125_vm2 = vcmp.gt.u32.totalorder %v117_v29, 2147483648  ;;  %vm126_vm3 = vcmp.gt.u32.totalorder %v118_v30, 2147483648  ;;  %v179_v35 = vsel %vm123_vm0, %v322_v37, 0.0  ;;  %v180_v36 = vsel %vm124_vm1, %v152_v45, 0.0 }
  0x29   :  { %v181_v39 = vsel %vm125_vm2, %v325_v44, 0.0  ;;  %v182_v40 = vsel %vm126_vm3, %v153_v54, 0.0  ;;  %v195_v41 = vcombine.low %v179_v35, %v180_v36  ;;  %v119_v46 = vxor.u32 %v111_v32, %v103_v24 }
  0x2a   :  { %v196_v43 = vcombine.low %v181_v39, %v182_v40  ;;  %v120_v47 = vxor.u32 %v112_v33, %v104_v27  ;;  %v121_v48 = vxor.u32 %v113_v34, %v105_v28  ;;  %v134_v50 = vmul.f32 2.0, %v132_v38 }
  0x2b   :  { %v203_v49 = vrot.slane %v195_v41, %v319_v11  ;;  %v122_v52 = vxor.u32 %v114_v42, %v106_v31  ;;  %vm127_vm4 = vcmp.gt.u32.totalorder %v119_v46, 2147483648 }
  0x2c   :  { %v210_v51 = vrot.slane %v196_v43, %v319_v11  ;;  %v154_v53 = vcombine.high %v134_v50, %v134_v50  ;;  %v161_v37 = vrot.slane %v134_v50, %v319_v11  ;;  %vm128_vm5 = vcmp.gt.u32.totalorder %v120_v47, 2147483648 }
  0x2d   :  { %vm129_vm6 = vcmp.gt.u32.totalorder %v121_v48, 2147483648  ;;  %vm130_vm7 = vcmp.gt.u32.totalorder %v122_v52, 2147483648 }
  0x2e   :  { %v211_v45 = vcombine.low %v203_v49, %v210_v51  ;;  %v168_v44 = vrot.slane %v154_v53, %v319_v11  ;;  %v169_v54 = vcombine.high %v161_v37, %v161_v37  ;;  %v183_v55 = vsel %vm127_vm4, %v161_v37, 0.0 }
  0x30   :  { %231 = vst [vmem:[#allocation6] sm:$0xff] %v211_v45  ;;  %v170_v56 = vcombine.high %v168_v44, %v168_v44  ;;  %v184_v57 = vsel %vm128_vm5, %v169_v54, 0.0  ;;  %v185_v58 = vsel %vm129_vm6, %v168_v44, 0.0 }
  0x31   :  { %v212_v59 = vcombine.low %v183_v55, %v184_v57 }
  0x32   :  { %v186_v60 = vsel %vm130_vm7, %v170_v56, 0.0 }
  0x33   :  { %v213_v61 = vcombine.low %v185_v58, %v186_v60  ;;  %v220_v62 = vrot.slane %v212_v59, %v319_v11 }
  0x35   :  { %v227_v63 = vrot.slane %v213_v61, %v319_v11 }
  0x37   :  { %v228_v0 = vcombine.low %v220_v62, %v227_v63 }
  0x39   :  { %232 = vst [vmem:[#allocation6 + $0x8] sm:$0xff] %v228_v0 }
  0x3a   :  { %282 = shalt.err (!%p279_p9)
}
  0x3b   :  { %242 = dma.vmem_to_hbm [thread:$0]  %s240_s1, 256, %s344_s2, [#allocation5]  }
  0x3c   :  { %293 = dma.done.wait [#allocation5], 256  }
  0x3d   :  { %294 = vsyncadd [#allocation5], 4294967040 }
  0x3e   :  { %246 = vsyncpa [#allocation4], 1 }
  0x3f   :  { %247 = vsyncpa [#allocation5], 1 }

</bundles_post_ra>
